<compile_context>
chip_gen: v6e
topology: v6e:2x2x1
jax: 0.10.0
libtpu: 0.0.40
codegen_flags: <defaults>
</compile_context>

<pallas_src>
import functools

import jax
import jax.numpy as jnp
from jax.experimental import pallas as pl
from jax.experimental.pallas import tpu as pltpu


def _cbam_ca_kernel(x_ref, w1_ref, w2_ref, o_ref, sum_ref, max_ref, *,
                    hw_total, lane_chunks):
    # x_ref   : VMEM (Bt, C, HWt)  -- one spatial tile of the input
    # w1_ref  : VMEM (C, Hp)       -- first 1x1 conv weight (hidden padded to 128)
    # w2_ref  : VMEM (Hp, C)       -- second 1x1 conv weight
    # o_ref   : VMEM (Bt, C)       -- sigmoid channel attention (flattened)
    # sum_ref / max_ref : VMEM (Bt, C, L) lane-parallel running sum / max
    k = pl.program_id(1)
    nk = pl.num_programs(1)

    @pl.when(k == 0)
    def _init():
        sum_ref[...] = jnp.zeros(sum_ref.shape, sum_ref.dtype)
        max_ref[...] = jnp.full(max_ref.shape, -jnp.inf, max_ref.dtype)

    x = x_ref[...].astype(jnp.float32)            # (Bt, C, HWt); cast in-kernel

    s = sum_ref[...]
    m = max_ref[...]
    if lane_chunks is not None:
        # Lane-parallel accumulation: plain VALU adds/maxes per 128-lane chunk.
        # The single cross-lane (XLU) reduce is deferred to the finalize step.
        for c in range(lane_chunks):
            blk = x[:, :, c * 128:(c + 1) * 128]
            s = s + blk
            m = jnp.maximum(m, blk)
    else:
        # Fallback (HW tile not a multiple of 128): per-step lane reduce.
        s = s + jnp.sum(x, axis=-1, keepdims=True)
        m = jnp.maximum(m, jnp.max(x, axis=-1, keepdims=True))
    sum_ref[...] = s
    max_ref[...] = m

    @pl.when(k == nk - 1)
    def _finalize():
        avg = jnp.sum(sum_ref[...], axis=-1) * (1.0 / hw_total)    # (Bt, C)
        mx = jnp.max(max_ref[...], axis=-1)                        # (Bt, C)

        def mlp(v):
            h = jnp.dot(v, w1_ref[...], preferred_element_type=jnp.float32)
            h = jnp.maximum(h, 0.0)                                # ReLU
            return jnp.dot(h, w2_ref[...], preferred_element_type=jnp.float32)

        y = mlp(mx) + mlp(avg)
        o_ref[...] = (1.0 / (1.0 + jnp.exp(-y))).astype(o_ref.dtype)


def cbam_ca_forward(x_nchw, w1, w2, *, max_hw_tile=2048,
                    max_block_bytes=4 * 1024 * 1024):
    """x_nchw: (B, C, H, W); w1: (C, Hid); w2: (Hid, C) (1x1 convs, no bias)."""
    B, C, H, W = x_nchw.shape
    HW = H * W
    x = x_nchw.reshape(B, C, HW)          # no dtype cast here (done in-kernel)

    # Batch tile: multiple of 8 when possible, otherwise the full (small) batch.
    b_t = 8 if (B % 8 == 0 and B > 8) else B

    # Spatial tile: largest multiple of 128 dividing HW within the byte cap.
    hw_t = None
    cand = min(max_hw_tile, (HW // 128) * 128) if HW >= 128 else 0
    while cand >= 128:
        if HW % cand == 0 and b_t * C * cand * 4 <= max_block_bytes:
            hw_t = cand
            break
        cand -= 128
    if hw_t is None:
        hw_t = 128 if HW % 128 == 0 else HW
    lane_chunks = hw_t // 128 if hw_t % 128 == 0 else None
    acc_lanes = 128 if lane_chunks is not None else 1

    # Pad the hidden dim to 128 lanes so MLP intermediates are lane-dense.
    hid = w1.shape[1]
    hid_p = max(128, ((hid + 127) // 128) * 128)
    w1p = jnp.zeros((C, hid_p), jnp.float32).at[:, :hid].set(w1.astype(jnp.float32))
    w2p = jnp.zeros((hid_p, C), jnp.float32).at[:hid, :].set(w2.astype(jnp.float32))

    grid = (B // b_t, HW // hw_t)
    kernel = functools.partial(_cbam_ca_kernel, hw_total=float(HW),
                               lane_chunks=lane_chunks)

    return pl.pallas_call(
        kernel,
        out_shape=jax.ShapeDtypeStruct((B, C), jnp.float32),
        grid_spec=pltpu.PrefetchScalarGridSpec(
            num_scalar_prefetch=0,
            grid=grid,
            in_specs=[
                pl.BlockSpec((b_t, C, hw_t), lambda b, k: (b, 0, k)),
                pl.BlockSpec((C, hid_p), lambda b, k: (0, 0)),
                pl.BlockSpec((hid_p, C), lambda b, k: (0, 0)),
            ],
            out_specs=pl.BlockSpec((b_t, C), lambda b, k: (b, 0)),
            scratch_shapes=[
                pltpu.VMEM((b_t, C, acc_lanes), jnp.float32),   # running sum
                pltpu.VMEM((b_t, C, acc_lanes), jnp.float32),   # running max
            ],
        ),
        compiler_params=pltpu.CompilerParams(
            dimension_semantics=("parallel", "arbitrary"),
            vmem_limit_bytes=64 * 1024 * 1024,
        ),
    )(x, w1p, w2p)


def _reference(x_nchw, w1, w2):
    # Pure-JAX reference mirroring the PyTorch CBAM_CA forward.
    avg = jnp.mean(x_nchw, axis=(-2, -1))          # (B, C)
    mx = jnp.max(x_nchw, axis=(-2, -1))            # (B, C)

    def mlp(v):
        return jnp.maximum(v @ w1, 0.0) @ w2       # shared no-bias MLP with ReLU

    return jax.nn.sigmoid(mlp(mx) + mlp(avg))      # (B, C)


if __name__ == "__main__":
    # channel=24, reduction=12 -> hidden=2 (matches the module's default reduction)
    B, C, H, W = 2, 24, 32, 32
    RED = 12
    HID = C // RED

    key = jax.random.PRNGKey(0)
    kx, k1, k2 = jax.random.split(key, 3)
    x = jax.random.uniform(kx, (B, C, H, W), jnp.float32, minval=-1.0, maxval=1.0)

    # PyTorch Conv2d default init: U(-1/sqrt(fan_in), 1/sqrt(fan_in)); 1x1 conv fan_in = C_in.
    bound1 = 1.0 / (C ** 0.5)
    bound2 = 1.0 / (HID ** 0.5)
    # w1 maps C -> HID (conv weight (HID, C, 1, 1), transposed); w2 maps HID -> C.
    w1 = jax.random.uniform(k1, (C, HID), jnp.float32, -bound1, bound1)
    w2 = jax.random.uniform(k2, (HID, C), jnp.float32, -bound2, bound2)

    # HW = 1024, max_hw_tile=256 -> 4 reduction steps, exercising the accumulator path.
    out = cbam_ca_forward(x, w1, w2, max_hw_tile=256)
    out = jax.block_until_ready(out)

    ref = _reference(x, w1, w2)
    assert out.shape == (B, C)
    assert jnp.allclose(out, ref, atol=1e-5, rtol=1e-5), (out, ref)
    print("KERNEL_OK")
</pallas_src>

<mosaic_0001>
module attributes {stable_mosaic.version = 11 : i64} {
  func.func @_cbam_ca_kernel(%arg0: i32, %arg1: i32, %arg2: memref<2x24x256xf32, #tpu.memory_space<vmem>>, %arg3: memref<24x128xf32, #tpu.memory_space<vmem>>, %arg4: memref<128x24xf32, #tpu.memory_space<vmem>>, %arg5: memref<2x24xf32, #tpu.memory_space<vmem>>, %arg6: memref<2x24x128xf32, #tpu.memory_space<vmem>>, %arg7: memref<2x24x128xf32, #tpu.memory_space<vmem>>) attributes {dimension_semantics = [#tpu.dimension_semantics<parallel>, #tpu.dimension_semantics<arbitrary>], iteration_bounds = array<i64: 1, 4>, scalar_prefetch = 0 : i64, scratch_operands = 2 : i64, tpu.core_type = #tpu.core_type<tc>, window_params = [{transform_indices = @transform_0, window_bounds = array<i64: 2, 24, 256>}, {pipeline_mode = #tpu.pipeline_mode<synchronous>, transform_indices = @transform_1, window_bounds = array<i64: 24, 128>}, {pipeline_mode = #tpu.pipeline_mode<synchronous>, transform_indices = @transform_2, window_bounds = array<i64: 128, 24>}, {transform_indices = @transform_3, window_bounds = array<i64: 2, 24>}]} {
    %c0_i32 = arith.constant 0 : i32
    %0 = arith.cmpi eq, %arg1, %c0_i32 : i32
    %1 = arith.extui %0 : i1 to i32
    %c0_i32_0 = arith.constant 0 : i32
    %2 = arith.cmpi ne, %1, %c0_i32_0 : i32
    scf.if %2 {
      %cst = arith.constant 0.000000e+00 : f32
      %17 = vector.broadcast %cst : f32 to vector<2x24x128xf32>
      %c0_16 = arith.constant 0 : index
      %c0_17 = arith.constant 0 : index
      %c0_18 = arith.constant 0 : index
      %18 = vector.load %arg6[%c0_16, %c0_17, %c0_18] : memref<2x24x128xf32, #tpu.memory_space<vmem>>, vector<2x24x128xf32>
      tpu.vector_store %arg6[%c0_16, %c0_17, %c0_18], %17 {strides = array<i32>} : memref<2x24x128xf32, #tpu.memory_space<vmem>>, vector<2x24x128xf32>,
      %cst_19 = arith.constant 0xFF800000 : f32
      %19 = vector.broadcast %cst_19 : f32 to vector<2x24x128xf32>
      %c0_20 = arith.constant 0 : index
      %c0_21 = arith.constant 0 : index
      %c0_22 = arith.constant 0 : index
      %20 = vector.load %arg7[%c0_20, %c0_21, %c0_22] : memref<2x24x128xf32, #tpu.memory_space<vmem>>, vector<2x24x128xf32>
      tpu.vector_store %arg7[%c0_20, %c0_21, %c0_22], %19 {strides = array<i32>} : memref<2x24x128xf32, #tpu.memory_space<vmem>>, vector<2x24x128xf32>,
    } else {
    }
    %c0 = arith.constant 0 : index
    %c0_1 = arith.constant 0 : index
    %c0_2 = arith.constant 0 : index
    %3 = vector.load %arg2[%c0, %c0_1, %c0_2] : memref<2x24x256xf32, #tpu.memory_space<vmem>>, vector<2x24x256xf32>
    %c0_3 = arith.constant 0 : index
    %c0_4 = arith.constant 0 : index
    %c0_5 = arith.constant 0 : index
    %4 = vector.load %arg6[%c0_3, %c0_4, %c0_5] : memref<2x24x128xf32, #tpu.memory_space<vmem>>, vector<2x24x128xf32>
    %c0_6 = arith.constant 0 : index
    %c0_7 = arith.constant 0 : index
    %c0_8 = arith.constant 0 : index
    %5 = vector.load %arg7[%c0_6, %c0_7, %c0_8] : memref<2x24x128xf32, #tpu.memory_space<vmem>>, vector<2x24x128xf32>
    %6 = vector.extract_strided_slice %3 {offsets = [0, 0, 0], sizes = [2, 24, 128], strides = [1, 1, 1]} : vector<2x24x256xf32> to vector<2x24x128xf32>
    %7 = arith.addf %4, %6 : vector<2x24x128xf32>
    %8 = arith.maximumf %5, %6 : vector<2x24x128xf32>
    %9 = vector.extract_strided_slice %3 {offsets = [0, 0, 128], sizes = [2, 24, 128], strides = [1, 1, 1]} : vector<2x24x256xf32> to vector<2x24x128xf32>
    %10 = arith.addf %7, %9 : vector<2x24x128xf32>
    %11 = arith.maximumf %8, %9 : vector<2x24x128xf32>
    %c0_9 = arith.constant 0 : index
    %c0_10 = arith.constant 0 : index
    %c0_11 = arith.constant 0 : index
    %12 = vector.load %arg6[%c0_9, %c0_10, %c0_11] : memref<2x24x128xf32, #tpu.memory_space<vmem>>, vector<2x24x128xf32>
    tpu.vector_store %arg6[%c0_9, %c0_10, %c0_11], %10 {strides = array<i32>} : memref<2x24x128xf32, #tpu.memory_space<vmem>>, vector<2x24x128xf32>,
    %c0_12 = arith.constant 0 : index
    %c0_13 = arith.constant 0 : index
    %c0_14 = arith.constant 0 : index
    %13 = vector.load %arg7[%c0_12, %c0_13, %c0_14] : memref<2x24x128xf32, #tpu.memory_space<vmem>>, vector<2x24x128xf32>
    tpu.vector_store %arg7[%c0_12, %c0_13, %c0_14], %11 {strides = array<i32>} : memref<2x24x128xf32, #tpu.memory_space<vmem>>, vector<2x24x128xf32>,
    %c3_i32 = arith.constant 3 : i32
    %14 = arith.cmpi eq, %arg1, %c3_i32 : i32
    %15 = arith.extui %14 : i1 to i32
    %c0_i32_15 = arith.constant 0 : i32
    %16 = arith.cmpi ne, %15, %c0_i32_15 : i32
    scf.if %16 {
      %c0_16 = arith.constant 0 : index
      %c0_17 = arith.constant 0 : index
      %c0_18 = arith.constant 0 : index
      %17 = vector.load %arg6[%c0_16, %c0_17, %c0_18] : memref<2x24x128xf32, #tpu.memory_space<vmem>>, vector<2x24x128xf32>
      %cst = arith.constant dense<0.000000e+00> : vector<2x24xf32>
      %18 = vector.multi_reduction <add>, %17, %cst [2] : vector<2x24x128xf32> to vector<2x24xf32>
      %cst_19 = arith.constant 9.765625E-4 : f32
      %19 = vector.broadcast %cst_19 : f32 to vector<2x24xf32>
      %20 = arith.mulf %18, %19 : vector<2x24xf32>
      %c0_20 = arith.constant 0 : index
      %c0_21 = arith.constant 0 : index
      %c0_22 = arith.constant 0 : index
      %21 = vector.load %arg7[%c0_20, %c0_21, %c0_22] : memref<2x24x128xf32, #tpu.memory_space<vmem>>, vector<2x24x128xf32>
      %cst_23 = arith.constant dense<0xFF800000> : vector<2x24xf32>
      %22 = vector.multi_reduction <maximumf>, %21, %cst_23 [2] : vector<2x24x128xf32> to vector<2x24xf32>
      %c0_24 = arith.constant 0 : index
      %c0_25 = arith.constant 0 : index
      %23 = vector.load %arg3[%c0_24, %c0_25] : memref<24x128xf32, #tpu.memory_space<vmem>>, vector<24x128xf32>
      %cst_26 = arith.constant dense<0.000000e+00> : vector<2x128xf32>
      %24 = tpu.matmul %22, %23, %cst_26 {dimension_numbers = #tpu.dot_dimension_numbers<[1], [0], [0], [1], [0, 0, 1, 1], [], []>} : vector<2x24xf32>, vector<24x128xf32>, vector<2x128xf32> -> vector<2x128xf32>
      %cst_27 = arith.constant 0.000000e+00 : f32
      %25 = vector.broadcast %cst_27 : f32 to vector<2x128xf32>
      %26 = arith.maximumf %24, %25 : vector<2x128xf32>
      %c0_28 = arith.constant 0 : index
      %c0_29 = arith.constant 0 : index
      %27 = vector.load %arg4[%c0_28, %c0_29] : memref<128x24xf32, #tpu.memory_space<vmem>>, vector<128x24xf32>
      %cst_30 = arith.constant dense<0.000000e+00> : vector<2x24xf32>
      %28 = tpu.matmul %26, %27, %cst_30 {dimension_numbers = #tpu.dot_dimension_numbers<[1], [0], [0], [1], [0, 0, 1, 1], [], []>} : vector<2x128xf32>, vector<128x24xf32>, vector<2x24xf32> -> vector<2x24xf32>
      %c0_31 = arith.constant 0 : index
      %c0_32 = arith.constant 0 : index
      %29 = vector.load %arg3[%c0_31, %c0_32] : memref<24x128xf32, #tpu.memory_space<vmem>>, vector<24x128xf32>
      %cst_33 = arith.constant dense<0.000000e+00> : vector<2x128xf32>
      %30 = tpu.matmul %20, %29, %cst_33 {dimension_numbers = #tpu.dot_dimension_numbers<[1], [0], [0], [1], [0, 0, 1, 1], [], []>} : vector<2x24xf32>, vector<24x128xf32>, vector<2x128xf32> -> vector<2x128xf32>
      %cst_34 = arith.constant 0.000000e+00 : f32
      %31 = vector.broadcast %cst_34 : f32 to vector<2x128xf32>
      %32 = arith.maximumf %30, %31 : vector<2x128xf32>
      %c0_35 = arith.constant 0 : index
      %c0_36 = arith.constant 0 : index
      %33 = vector.load %arg4[%c0_35, %c0_36] : memref<128x24xf32, #tpu.memory_space<vmem>>, vector<128x24xf32>
      %cst_37 = arith.constant dense<0.000000e+00> : vector<2x24xf32>
      %34 = tpu.matmul %32, %33, %cst_37 {dimension_numbers = #tpu.dot_dimension_numbers<[1], [0], [0], [1], [0, 0, 1, 1], [], []>} : vector<2x128xf32>, vector<128x24xf32>, vector<2x24xf32> -> vector<2x24xf32>
      %35 = arith.addf %28, %34 : vector<2x24xf32>
      %cst_38 = arith.constant 0.000000e+00 : f32
      %36 = vector.broadcast %cst_38 : f32 to vector<2x24xf32>
      %37 = arith.subf %36, %35 : vector<2x24xf32>
      %38 = math.exp %37 : vector<2x24xf32>
      %cst_39 = arith.constant 1.000000e+00 : f32
      %39 = vector.broadcast %cst_39 : f32 to vector<2x24xf32>
      %40 = arith.addf %39, %38 : vector<2x24xf32>
      %cst_40 = arith.constant 1.000000e+00 : f32
      %41 = vector.broadcast %cst_40 : f32 to vector<2x24xf32>
      %42 = arith.divf %41, %40 : vector<2x24xf32>
      %c0_41 = arith.constant 0 : index
      %c0_42 = arith.constant 0 : index
      %43 = vector.load %arg5[%c0_41, %c0_42] : memref<2x24xf32, #tpu.memory_space<vmem>>, vector<2x24xf32>
      tpu.vector_store %arg5[%c0_41, %c0_42], %42 {strides = array<i32>} : memref<2x24xf32, #tpu.memory_space<vmem>>, vector<2x24xf32>,
    } else {
    }
    return
  }
  func.func @transform_0(%arg0: i32, %arg1: i32) -> (i32, i32, i32) {
    %c0_i32 = arith.constant 0 : i32
    %c0_i32_0 = arith.constant 0 : i32
    return %arg0, %c0_i32, %arg1 : i32, i32, i32
  }
  func.func @transform_1(%arg0: i32, %arg1: i32) -> (i32, i32) {
    %c0_i32 = arith.constant 0 : i32
    %c0_i32_0 = arith.constant 0 : i32
    %c0_i32_1 = arith.constant 0 : i32
    return %c0_i32, %c0_i32_0 : i32, i32
  }
  func.func @transform_2(%arg0: i32, %arg1: i32) -> (i32, i32) {
    %c0_i32 = arith.constant 0 : i32
    %c0_i32_0 = arith.constant 0 : i32
    %c0_i32_1 = arith.constant 0 : i32
    return %c0_i32, %c0_i32_0 : i32, i32
  }
  func.func @transform_3(%arg0: i32, %arg1: i32) -> (i32, i32) {
    %c0_i32 = arith.constant 0 : i32
    %c0_i32_0 = arith.constant 0 : i32
    return %arg0, %c0_i32 : i32, i32
  }
}

</mosaic_0001>

<bundles_post_ra>
// kernel: tpu_custom_call.1
= control target key start
LH: loop header
LB: loop body
LE: loop exit
PB: predicated region body
PF: predicated region fallthrough
CT: control target
= control target key end

     0   :  { %8 = vsyncpa [#allocation5], 0  ;;  %s1381_s0 = inlined_call_operand.hbm [shape: f32[2,24,1024], index: 0, kind: input, shape index: {}]   ;;  %s1382_s1 = inlined_call_operand.vmem [shape: f32[24,128], index: 1, kind: input, shape index: {}]   ;;  %s1383_s2 = inlined_call_operand.vmem [shape: f32[128,24], index: 2, kind: input, shape index: {}]   ;;  %s1384_s3 = inlined_call_operand.hbm [shape: f32[2,24], index: 3, kind: output, shape index: {}]  }
   0x1   :  { %10 = vsyncpa [#allocation5 + $0x1], 0 }
   0x2   :  { %11 = vsyncpa [#allocation6], 0  ;;  %s1144_s12 = smov 0   ;;  %s1146_s13 = smov 0  }
   0x3   :  { %s1148_s14 = smov 0   ;;  %s1150_s15 = smov 0  }
   0x4   :  { %s1152_s16 = smov 0   ;;  %s1154_s17 = smov 0  }
   0x5 LB: > { %s787_s18 = sadd.s32 4294967295, %s1113_s17   ;;  %s26_s19 = sadd.s32 1, %s1109_s16  ;;  %s1113_s17 = sphi %s1154_s17, %s17_s17   ;;  %s1109_s16 = sphi %s1152_s16, %s1392_s16   ;;  %s1105_s15 = sphi %s1150_s15, %s1391_s15   ;;  %s1101_s14 = sphi %s1148_s14, %s1390_s14   ;;  %s1097_s13 = sphi %s1146_s13, %s1389_s13   ;;  %s1093_s12 = sphi %s1144_s12, %s1388_s12  }
   0x6   : > { %p27_p0 = scmp.ge.s32.totalorder %s26_s19, 4  ;;  %s38_s20 = sadd.s32 1, %s1101_s14 }
   0x7   : > { %p45_p1 = scmp.ne.s32.totalorder %s1101_s14, %s1097_s13  ;;  %p46_p2 = scmp.eq.s32.totalorder %s1113_s17, 0 }
   0x8   : > { %s1394_s19 = smov (%p27_p0, %s26_s19), 0  ;;  %p51_p4 = scmp.ne.s32.totalorder %s1097_s13, %s1093_s12 }
   0x9   : > { %p47_p3 = por %p46_p2, %p45_p1  ;;  %s34_s21 = ssub.s32 %s1109_s16, %s1394_s19 }
   0xa   : > { %p52_p5 = scmp.eq.s32.totalorder %s787_s18, 0  ;;  %p36_p6 = scmp.eq.s32.totalorder %s34_s21, 0 }
   0xb   : > { %p944_p8 = scmp.lt.s32.totalorder %s1113_s17, 4  ;;  %s149_s24 = sand.u32 1, %s1101_s14  }
   0xc   : > { %p1185_p7 = por %p52_p5, %p51_p4  ;;  %s801_s25 = sshll.u32 %s1109_s16, 8 }
   0xd   : > { %s1191_s23 = scalar_select %p36_p6, %s1101_s14, %s38_s20  }
   0xe   : > { %s932_s26 = smul.u32 96, %s149_s24  ;;  %s162_s29 = scalar_lea.hbm %s1381_s0, %s801_s25 }
   0xf   : > { %p1198_p9 = pnand %p944_p8, %p47_p3  ;;  %p792_p10 = scmp.ge.s32.totalorder %s1113_s17, 1 }
  0x10   : > { %s153_s4 = scalar_lea.vmem [#allocation4], %s932_s26  ;;  %s150_s6 = scalar_lea.sflag [#allocation5], %s149_s24 }
  0x11   : > { %s163_s5 = sshll.u32 %s153_s4, 4  ;;  %p1009_p11 = pneg %p1198_p9  ;;  %s164_s5 = int_to_ptr.vmem [resolvable:$true] %s163_s5 }
  0x12   : > { %s1020_s7 = scalar_lea.vmem %s164_s5, 1536  ;;  %s1115_s8 = smov [#allocation4]  }
  0x13   : > { %p1021_p12 = scmp.ne.s32.totalorder %s164_s5, %s1020_s7  ;;  %s1025_s9 = sshll.u32 %s1115_s8, 4  ;;  %s1026_s9 = int_to_ptr.vmem [resolvable:$false] %s1025_s9 }
  0x14   : > { %s1027_s10 = scalar_lea.vmem %s1026_s9, 3072  ;;  %p1028_p1 = scmp.lt.s32.totalorder %s164_s5, %s1026_s9 }
  0x15   : > { %p1023_p13 = pnand %p1021_p12, %p1009_p11  ;;  %p1029_p2 = scmp.lt.s32.totalorder %s1027_s10, %s1020_s7 }
  0x17   : > { %p1024_p0 = pneg %p1023_p13  ;;  %p1030_p3 = por %p1029_p2, %p1028_p1 }
  0x19   : > { %p1031_p4 = pnand %p1030_p3, %p1024_p0 }
  0x1b   : > { %1034 = shalt.err (!%p1031_p4)
}
  0x1c   : > { %s1116_s11 = smov 1024   ;;  %s1117_s12 = smov 256  }
  0x1d   : > { %s1118_s20 = smov 16   ;;  %p171_p5 = scmp.lt.s32.totalorder %s1113_s17, 5 }
  0x1e   : > { %943 = dma.hbm_to_vmem [thread:$0]  (!%p1198_p9), %s162_s29, 1536, %s164_s5, %s150_s6, %s1116_s11, %s1117_s12, %s1118_s20  }
  0x1f   : > { %p172_p6 = pnand %p792_p10, %p171_p5 }
  0x20   : > { %s177_s21 = sand.u32 (!%p172_p6), 1, %s1097_s13  }
  0x21   : > { %175 = sbr.rel (%p172_p6) target bundleno = 671 (0x29f), region = 32  ;;  %s178_s25 = scalar_lea.sflag (!%p172_p6), [#allocation5], %s177_s21 }
  0x22   : > { %s933_s24 = smul.u32 (!%p172_p6), 96, %s177_s21 }
  0x24   : > { %s1211_s26 = scalar_lea.vmem (!%p172_p6), [#allocation4], %s933_s24 }
  0x26   : > { %1084 = dma.done.wait (%p1185_p7), %s178_s25, 1536  }
  0x27   : > { %1086 = vsyncadd (%p1185_p7), %s178_s25, 4294965760  ;;  %p793_p8 = scmp.ne.s32.totalorder %s1105_s15, 0 }
  0x29   : > { %204 = sbr.rel (%p793_p8) target bundleno = 53 (0x35), region = 40 }
  0x2e   : > { %v1119_v0 = vmov 0.0   ;;  %v1120_v1 = vmov -inf  }
  0x2f   : > { %205 = vst [vmem:[#allocation2 + $0x28] sm:$0xff] %v1119_v0  ;;  %206 = vst [vmem:[#allocation2 + $0x10] sm:$0xff] %v1119_v0 }
  0x30   : > { %207 = vst [vmem:[#allocation2 + $0x8] sm:$0xff] %v1119_v0  ;;  %208 = vst [vmem:[#allocation2] sm:$0xff] %v1119_v0 }
  0x31   : > { %209 = vst [vmem:[#allocation2 + $0x18] sm:$0xff] %v1119_v0  ;;  %210 = vst [vmem:[#allocation2 + $0x20] sm:$0xff] %v1119_v0 }
  0x32   : > { %211 = vst [vmem:[#allocation3] sm:$0xff] %v1120_v1  ;;  %212 = vst [vmem:[#allocation3 + $0x8] sm:$0xff] %v1120_v1 }
  0x33   : > { %213 = vst [vmem:[#allocation3 + $0x20] sm:$0xff] %v1120_v1  ;;  %214 = vst [vmem:[#allocation3 + $0x18] sm:$0xff] %v1120_v1 }
  0x34   : > { %215 = vst [vmem:[#allocation3 + $0x28] sm:$0xff] %v1120_v1  ;;  %216 = vst [vmem:[#allocation3 + $0x10] sm:$0xff] %v1120_v1 }
  0x35 PF: > { %v217_v2 = vld [vmem:[%s1211_s26] sm:$0xff]  ;;  %v218_v3 = vld [vmem:[%s1211_s26 + $0x8] sm:$0xff]  ;;  %v219_v6 = vld [vmem:[%s1211_s26 + $0x10] sm:$0xff]  ;;  %p794_p7 = scmp.ne.s32.totalorder %s1105_s15, 3 }
  0x36   : > { %v229_v4 = vld [vmem:[#allocation2 + $0x28] sm:$0xff]  ;;  %v220_v7 = vld [vmem:[%s1211_s26 + $0x18] sm:$0xff]  ;;  %v230_v8 = vld [vmem:[#allocation2 + $0x10] sm:$0xff] }
  0x37   : > { %v241_v5 = vadd.f32 %v229_v4, %v217_v2  ;;  %v242_v9 = vadd.f32 %v230_v8, %v219_v6  ;;  %v221_v10 = vld [vmem:[%s1211_s26 + $0x20] sm:$0xff]  ;;  %v222_v11 = vld [vmem:[%s1211_s26 + $0x28] sm:$0xff]  ;;  %v223_v15 = vld [vmem:[%s1211_s26 + $0x30] sm:$0xff] }
  0x38   : > { %v231_v12 = vld [vmem:[#allocation2 + $0x8] sm:$0xff]  ;;  %v224_v16 = vld [vmem:[%s1211_s26 + $0x38] sm:$0xff]  ;;  %v232_v17 = vld [vmem:[#allocation2] sm:$0xff] }
  0x39   : > { %v253_v13 = vadd.f32 %v241_v5, %v218_v3  ;;  %v243_v14 = vadd.f32 %v231_v12, %v221_v10  ;;  %v254_v18 = vadd.f32 %v242_v9, %v220_v7  ;;  %v244_v19 = vadd.f32 %v232_v17, %v223_v15  ;;  %v225_v20 = vld [vmem:[%s1211_s26 + $0x40] sm:$0xff]  ;;  %v226_v21 = vld [vmem:[%s1211_s26 + $0x48] sm:$0xff]  ;;  %v233_v22 = vld [vmem:[#allocation2 + $0x18] sm:$0xff] }
  0x3a   : > { %v245_v24 = vadd.f32 %v233_v22, %v225_v20  ;;  %v227_v25 = vld [vmem:[%s1211_s26 + $0x50] sm:$0xff]  ;;  %v228_v26 = vld [vmem:[%s1211_s26 + $0x58] sm:$0xff]  ;;  %v234_v27 = vld [vmem:[#allocation2 + $0x20] sm:$0xff] }
  0x3b   : > { %265 = vst [vmem:[#allocation2 + $0x28] sm:$0xff] %v253_v13  ;;  %v255_v23 = vadd.f32 %v243_v14, %v222_v11  ;;  %266 = vst [vmem:[#allocation2 + $0x10] sm:$0xff] %v254_v18  ;;  %v256_v28 = vadd.f32 %v244_v19, %v224_v16  ;;  %v246_v29 = vadd.f32 %v234_v27, %v227_v25  ;;  %v235_v30 = vld [vmem:[#allocation3] sm:$0xff]  ;;  %v236_v31 = vld [vmem:[#allocation3 + $0x8] sm:$0xff] }
  0x3c   : > { %v237_v32 = vld [vmem:[#allocation3 + $0x20] sm:$0xff]  ;;  %v257_v33 = vadd.f32 %v245_v24, %v226_v21  ;;  %v247_v34 = vmax.f32 %v235_v30, %v217_v2  ;;  %v248_v35 = vmax.f32 %v236_v31, %v219_v6  ;;  %v238_v37 = vld [vmem:[#allocation3 + $0x18] sm:$0xff]  ;;  %v239_v38 = vld [vmem:[#allocation3 + $0x28] sm:$0xff] }
  0x3d   : > { %267 = vst [vmem:[#allocation2 + $0x8] sm:$0xff] %v255_v23  ;;  %v249_v36 = vmax.f32 %v237_v32, %v221_v10  ;;  %v240_v39 = vld [vmem:[#allocation3 + $0x10] sm:$0xff]  ;;  %268 = vst [vmem:[#allocation2] sm:$0xff] %v256_v28  ;;  %v258_v40 = vadd.f32 %v246_v29, %v228_v26  ;;  %v250_v41 = vmax.f32 %v238_v37, %v223_v15 }
  0x3e   : > { %v251_v42 = vmax.f32 %v239_v38, %v225_v20  ;;  %v252_v43 = vmax.f32 %v240_v39, %v227_v25  ;;  %269 = vst [vmem:[#allocation2 + $0x18] sm:$0xff] %v257_v33  ;;  %v259_v44 = vmax.f32 %v247_v34, %v218_v3  ;;  %v260_v45 = vmax.f32 %v248_v35, %v220_v7  ;;  %280 = sbr.rel (%p794_p7) target bundleno = 656 (0x290), region = 44 }
  0x3f   : > { %v261_v46 = vmax.f32 %v249_v36, %v222_v11  ;;  %270 = vst [vmem:[#allocation2 + $0x20] sm:$0xff] %v258_v40  ;;  %v262_v47 = vmax.f32 %v250_v41, %v224_v16 }
  0x40   : > { %v263_v48 = vmax.f32 %v251_v42, %v226_v21  ;;  %v264_v49 = vmax.f32 %v252_v43, %v228_v26  ;;  %271 = vst [vmem:[#allocation3] sm:$0xff] %v259_v44  ;;  %272 = vst [vmem:[#allocation3 + $0x8] sm:$0xff] %v260_v45 }
  0x41   : > { %273 = vst [vmem:[#allocation3 + $0x20] sm:$0xff] %v261_v46  ;;  %274 = vst [vmem:[#allocation3 + $0x18] sm:$0xff] %v262_v47 }
  0x42   : > { %275 = vst [vmem:[#allocation3 + $0x28] sm:$0xff] %v263_v48  ;;  %276 = vst [vmem:[#allocation3 + $0x10] sm:$0xff] %v264_v49 }
  0x43   : > { %v281_v51 = vld [vmem:[#allocation2 + $0x28] sm:$0xff]  ;;  %v282_v53 = vld [vmem:[#allocation2 + $0x10] sm:$0xff]  ;;  %v1121_v62 = vmov 0.0   ;;  %v323_v1 = vld [vmem:[%s1382_s1] sm:$0xff]  ;;  %vm1122_vm0 = vmmov 0   ;;  %v332_v2 = vlaneseq  ;;  %vm343_vm1 = vcmask 130112  }
  0x44   : > { %v284_v50 = vld [vmem:[#allocation2] sm:$0xff]  ;;  %287 = vadd.xlane.f32.xlu0 %v281_v51  ;;  %v283_v55 = vld [vmem:[#allocation2 + $0x8] sm:$0xff]  ;;  %853 = vmatprep.subr.mxu1 %v1121_v62  ;;  %v325_v63 = vld [vmem:[%s1382_s1 + $0x10] sm:$0xff]  ;;  %vm350_vm2 = vcmask 195712   ;;  %vm366_vm3 = vcmask 1041409   ;;  %vm368_vm4 = vcmask 195584  }
  0x45   : > { %293 = vadd.xlane.f32.xlu1 %v284_v50  ;;  %v285_v52 = vld [vmem:[#allocation2 + $0x18] sm:$0xff]  ;;  %844 = vmatprep.subr.mxu0 %v1121_v62  ;;  %v324_v0 = vld [vmem:[%s1382_s1 + $0x8] sm:$0xff]  ;;  %v333_v3 = vand.u32 127, %v332_v2  ;;  %v335_v7 = vshrl.u32 %v332_v2, 7  ;;  %v456_v38 = vld [vmem:[%s1383_s2 + $0x70] sm:$0xff]  ;;  %vm712_vm5 = vcmask 189440  }
  0x46   : > { %v286_v54 = vld [vmem:[#allocation2 + $0x20] sm:$0xff]  ;;  %854 = vmatpush3.msra.mxu1 %v325_v63  ;;  %845 = vmatpush3.msra.mxu0 %v325_v63  ;;  %v457_v35 = vld [vmem:[%s1383_s2 + $0x78] sm:$0xff]  ;;  %v455_v43 = vld [vmem:[%s1383_s2 + $0x68] sm:$0xff] }
  0x47   : > { %v306_v56 = vld [vmem:[#allocation3 + $0x8] sm:$0xff]  ;;  %v305_v57 = vld [vmem:[#allocation3] sm:$0xff]  ;;  %855 = vmatprep.subr.mxu1 %v1121_v62  ;;  %846 = vmatprep.subr.mxu0 %v1121_v62  ;;  %v338_v6 = vadd.s32 4294967288, %v333_v3  ;;  %v345_v8 = vadd.s32 4294967280, %v333_v3  ;;  %v336_v14 = vsub.s32 %v333_v3, %v335_v7  ;;  %v454_v48 = vld [vmem:[%s1383_s2 + $0x60] sm:$0xff] }
  0x48   : > { %289 = vadd.xlane.f32.xlu0 %v282_v53  ;;  %v308_v59 = vld [vmem:[#allocation3 + $0x18] sm:$0xff]  ;;  %v307_v61 = vld [vmem:[#allocation3 + $0x20] sm:$0xff]  ;;  %856 = vmatpush3.msra.mxu1 %v324_v0  ;;  %v453_v53 = vld [vmem:[%s1383_s2 + $0x58] sm:$0xff] }
  0x49   : > { %295 = vadd.xlane.f32.xlu1 %v285_v52  ;;  %v309_v58 = vld [vmem:[#allocation3 + $0x28] sm:$0xff]  ;;  %v310_v60 = vld [vmem:[#allocation3 + $0x10] sm:$0xff]  ;;  %847 = vmatpush3.msra.mxu0 %v324_v0  ;;  %v341_v9 = vsub.s32 %v338_v6, %v335_v7  ;;  %v348_v17 = vsub.s32 %v345_v8, %v335_v7  ;;  %v444_v0 = vld [vmem:[%s1383_s2 + $0x10] sm:$0xff] }
  0x4a   : > { %857 = vmatprep.subr.mxu1 %v1121_v62  ;;  %859 = vmatprep.mubr.msk.f32.mxu1 %vm1122_vm0, %v1121_v62  ;;  %v445_v63 = vld [vmem:[%s1383_s2 + $0x18] sm:$0xff]  ;;  %v442_v2 = vld [vmem:[%s1383_s2] sm:$0xff] }
  0x4b   : > { %858 = vmatpush3.msra.mxu1 %v323_v1  ;;  %848 = vmatprep.subr.mxu0 %v1121_v62 }
  0x4c   : > { %291 = vadd.xlane.f32.xlu0 %v283_v55  ;;  %849 = vmatpush3.msra.mxu0 %v323_v1  ;;  %v452_v55 = vld [vmem:[%s1383_s2 + $0x50] sm:$0xff]  ;;  %v443_v1 = vld [vmem:[%s1383_s2 + $0x8] sm:$0xff] }
  0x4d   : > { %297 = vadd.xlane.f32.xlu1 %v286_v54  ;;  %850 = vmatprep.mubr.msk.f32.mxu0 %vm1122_vm0, %v1121_v62 }
  0x4e   : > { %862 = vmatprep.subr.mxu0 %v1121_v62  ;;  %897 = vmatprep.subr.mxu1 %v1121_v62 }
  0x50   : > { %311 = vmax.xlane.f32.xlu0 %v305_v57  ;;  %v450_v57 = vld [vmem:[%s1383_s2 + $0x40] sm:$0xff] }
  0x51   : > { %313 = vmax.xlane.f32.xlu1 %v306_v56  ;;  %v451_v56 = vld [vmem:[%s1383_s2 + $0x48] sm:$0xff] }
  0x54   : > { %317 = vmax.xlane.f32.xlu0 %v308_v59  ;;  %v448_v59 = vld [vmem:[%s1383_s2 + $0x30] sm:$0xff] }
  0x55   : > { %319 = vmax.xlane.f32.xlu1 %v309_v58  ;;  %v449_v58 = vld [vmem:[%s1383_s2 + $0x38] sm:$0xff] }
  0x58   : > { %315 = vmax.xlane.f32.xlu0 %v307_v61  ;;  %v446_v61 = vld [vmem:[%s1383_s2 + $0x20] sm:$0xff] }
  0x59   : > { %321 = vmax.xlane.f32.xlu1 %v310_v60  ;;  %v447_v60 = vld [vmem:[%s1383_s2 + $0x28] sm:$0xff] }
  0xcd   : > { %v288_v5 = vpop.xlane.xlu0 %287 }
  0xce   : > { %v294_v4 = vpop.xlane.xlu1 %293  ;;  %v299_v16 = vmul.f32 0.0009765625, %v288_v5 }
  0xcf   : > { %v302_v15 = vmul.f32 0.0009765625, %v294_v4 }
  0xd0   : > { %v467_v25 = vrot.slane %v299_v16, %v336_v14 }
  0xd1   : > { %v290_v11 = vpop.xlane.xlu0 %289  ;;  %v481_v24 = vrot.slane %v302_v15, %v336_v14 }
  0xd2   : > { %v296_v10 = vpop.xlane.xlu1 %295  ;;  %v300_v13 = vmul.f32 0.0009765625, %v290_v11 }
  0xd3   : > { %v303_v12 = vmul.f32 0.0009765625, %v296_v10 }
  0xd4   : > { %v471_v19 = vrot.slane %v300_v13, %v341_v9 }
  0xd5   : > { %v485_v18 = vrot.slane %v303_v12, %v341_v9  ;;  %v292_v21 = vpop.xlane.xlu0 %291 }
  0xd6   : > { %v298_v20 = vpop.xlane.xlu1 %297  ;;  %v301_v23 = vmul.f32 0.0009765625, %v292_v21  ;;  %v472_v29 = vsel %vm343_vm1, %v471_v19, %v467_v25 }
  0xd7   : > { %v304_v22 = vmul.f32 0.0009765625, %v298_v20  ;;  %v486_v28 = vsel %vm343_vm1, %v485_v18, %v481_v24 }
  0xd8   : > { %v476_v27 = vrot.slane %v301_v23, %v348_v17 }
  0xd9   : > { %v490_v26 = vrot.slane %v304_v22, %v348_v17  ;;  %v312_v31 = vpop.xlane.xlu0 %311 }
  0xda   : > { %v314_v30 = vpop.xlane.xlu1 %313  ;;  %v477_v32 = vsel %vm350_vm2, %v476_v27, %v472_v29  ;;  %v337_v40 = vrot.slane %v312_v31, %v336_v14 }
  0xdb   : > { %v491_v33 = vsel %vm350_vm2, %v490_v26, %v486_v28  ;;  %v342_v39 = vrot.slane %v314_v30, %v341_v9 }
  0xdc   : > { %v492_v34 = vsel %vm366_vm3, %v491_v33, %v477_v32 }
  0xdd   : > { %860 = vmatmul.mubr.msk.f32.vlgmr.msra.gmra.mxu1 %vm368_vm4, %v492_v34  ;;  %v318_v37 = vpop.xlane.xlu0 %317  ;;  %v344_v49 = vsel %vm343_vm1, %v342_v39, %v337_v40 }
  0xde   : > { %v320_v36 = vpop.xlane.xlu1 %319  ;;  %898 = vmatpush3.msra.mxu1 %v457_v35  ;;  %929 = vmatprep.mubr.msk.f32.mxu1 %vm1122_vm0, %v1121_v62  ;;  %v355_v42 = vrot.slane %v318_v37, %v336_v14 }
  0xdf   : > { %899 = vmatprep.subr.mxu1 %v1121_v62  ;;  %v359_v41 = vrot.slane %v320_v36, %v341_v9 }
  0xe0   : > { %900 = vmatpush3.msra.mxu1 %v456_v38 }
  0xe1   : > { %901 = vmatprep.subr.mxu1 %v1121_v62  ;;  %v316_v45 = vpop.xlane.xlu0 %315  ;;  %v360_v50 = vsel %vm343_vm1, %v359_v41, %v355_v42 }
  0xe2   : > { %v322_v44 = vpop.xlane.xlu1 %321  ;;  %902 = vmatpush3.msra.mxu1 %v455_v43  ;;  %v349_v47 = vrot.slane %v316_v45, %v348_v17 }
  0xe3   : > { %v364_v46 = vrot.slane %v322_v44, %v348_v17  ;;  %903 = vmatprep.subr.mxu1 %v1121_v62 }
  0xe4   : > { %904 = vmatpush3.msra.mxu1 %v454_v48  ;;  %v351_v52 = vsel %vm350_vm2, %v349_v47, %v344_v49 }
  0xe5   : > { %v365_v51 = vsel %vm350_vm2, %v364_v46, %v360_v50  ;;  %905 = vmatprep.subr.mxu1 %v1121_v62 }
  0xe6   : > { %v367_v54 = vsel %vm366_vm3, %v365_v51, %v351_v52  ;;  %906 = vmatpush3.msra.mxu1 %v453_v53 }
  0xe7   : > { %851 = vmatmul.mubr.msk.f32.vlgmr.msra.gmra.mxu0 %vm368_vm4, %v367_v54  ;;  %907 = vmatprep.subr.mxu1 %v1121_v62 }
  0xe8   : > { %863 = vmatpush3.msra.mxu0 %v457_v35  ;;  %908 = vmatpush3.msra.mxu1 %v452_v55 }
  0xe9   : > { %864 = vmatprep.subr.mxu0 %v1121_v62  ;;  %909 = vmatprep.subr.mxu1 %v1121_v62 }
  0xea   : > { %865 = vmatpush3.msra.mxu0 %v456_v38  ;;  %910 = vmatpush3.msra.mxu1 %v451_v56 }
  0xeb   : > { %866 = vmatprep.subr.mxu0 %v1121_v62  ;;  %911 = vmatprep.subr.mxu1 %v1121_v62 }
  0xec   : > { %867 = vmatpush3.msra.mxu0 %v455_v43  ;;  %912 = vmatpush3.msra.mxu1 %v450_v57 }
  0xed   : > { %868 = vmatprep.subr.mxu0 %v1121_v62  ;;  %913 = vmatprep.subr.mxu1 %v1121_v62 }
  0xee   : > { %869 = vmatpush3.msra.mxu0 %v454_v48  ;;  %914 = vmatpush3.msra.mxu1 %v449_v58 }
  0xef   : > { %870 = vmatprep.subr.mxu0 %v1121_v62  ;;  %915 = vmatprep.subr.mxu1 %v1121_v62 }
  0xf0   : > { %871 = vmatpush3.msra.mxu0 %v453_v53  ;;  %916 = vmatpush3.msra.mxu1 %v448_v59 }
  0xf1   : > { %872 = vmatprep.subr.mxu0 %v1121_v62  ;;  %917 = vmatprep.subr.mxu1 %v1121_v62 }
  0xf2   : > { %873 = vmatpush3.msra.mxu0 %v452_v55  ;;  %894 = vmatprep.mubr.msk.f32.mxu0 %vm1122_vm0, %v1121_v62 }
  0xf3   : > { %874 = vmatprep.subr.mxu0 %v1121_v62  ;;  %918 = vmatpush3.msra.mxu1 %v447_v60 }
  0xf4   : > { %875 = vmatpush3.msra.mxu0 %v451_v56  ;;  %919 = vmatprep.subr.mxu1 %v1121_v62 }
  0xf5   : > { %876 = vmatprep.subr.mxu0 %v1121_v62  ;;  %920 = vmatpush3.msra.mxu1 %v446_v61 }
  0xf6   : > { %877 = vmatpush3.msra.mxu0 %v450_v57  ;;  %921 = vmatprep.subr.mxu1 %v1121_v62 }
  0xf7   : > { %878 = vmatprep.subr.mxu0 %v1121_v62  ;;  %922 = vmatpush3.msra.mxu1 %v445_v63 }
  0xf8   : > { %879 = vmatpush3.msra.mxu0 %v449_v58  ;;  %923 = vmatprep.subr.mxu1 %v1121_v62 }
  0xf9   : > { %880 = vmatprep.subr.mxu0 %v1121_v62  ;;  %924 = vmatpush3.msra.mxu1 %v444_v0 }
  0xfa   : > { %881 = vmatpush3.msra.mxu0 %v448_v59  ;;  %925 = vmatprep.subr.mxu1 %v1121_v62 }
  0xfb   : > { %882 = vmatprep.subr.mxu0 %v1121_v62  ;;  %926 = vmatpush3.msra.mxu1 %v443_v1 }
  0xfc   : > { %883 = vmatpush3.msra.mxu0 %v447_v60  ;;  %927 = vmatprep.subr.mxu1 %v1121_v62 }
  0xfd   : > { %884 = vmatprep.subr.mxu0 %v1121_v62  ;;  %928 = vmatpush3.msra.mxu1 %v442_v2 }
  0xfe   : > { %885 = vmatpush3.msra.mxu0 %v446_v61 }
  0xff   : > { %886 = vmatprep.subr.mxu0 %v1121_v62 }
 0x100   : > { %887 = vmatpush3.msra.mxu0 %v445_v63 }
 0x101   : > { %888 = vmatprep.subr.mxu0 %v1121_v62 }
 0x102   : > { %889 = vmatpush3.msra.mxu0 %v444_v0 }
 0x103   : > { %890 = vmatprep.subr.mxu0 %v1121_v62 }
 0x104   : > { %891 = vmatpush3.msra.mxu0 %v443_v1 }
 0x105   : > { %892 = vmatprep.subr.mxu0 %v1121_v62 }
 0x106   : > { %893 = vmatpush3.msra.mxu0 %v442_v2 }
 0x19d   : > { %v561_v3 = vpop.f32.mrf.mxu1 }
 0x19e   : > { %v565_v4 = vmax.f32 %v561_v3, 0.0 }
 0x19f   : > { %v861_v5 = vpop.f32.mrf.mxu1 }
 0x1a0   : > { %895 = vmatmul.mubr.f32.vlgmr.msra.gmra.mxu0 %v565_v4 }
 0x1a7   : > { %v437_v6 = vpop.f32.mrf.mxu0 }
 0x1a8   : > { %v441_v7 = vmax.f32 %v437_v6, 0.0 }
 0x1a9   : > { %v852_v8 = vpop.f32.mrf.mxu0 }
 0x1aa   : > { %930 = vmatmul.mubr.f32.vlgmr.msra.gmra.mxu1 %v441_v7 }
 0x260   : > { %v632_v9 = vpop.f32.mrf.mxu0 }
 0x262   : > { %v896_v10 = vpop.f32.mrf.mxu0 }
 0x26a   : > { %v702_v11 = vpop.f32.mrf.mxu1 }
 0x26b   : > { %v703_v12 = vadd.f32 %v702_v11, %v632_v9 }
 0x26c   : > { %v931_v13 = vpop.f32.mrf.mxu1 }
 0x26d   : > { %v706_v14 = vsub.f32 0.0, %v703_v12 }
 0x26f   : > { %v707_v15 = vmul.f32 1.442695, %v706_v14 }
 0x271   : > { %1003 = vpow2.f32 %v707_v15 }
 0x27e   : > { %v1004_v16 = vpop.eup %1003 }
 0x27f   : > { %v709_v62 = vadd.f32 1.0, %v1004_v16 }
 0x281   : > { %1005 = vrcp.f32 %v709_v62 }
 0x28e   : > { %v1006_v17 = vpop.eup %1005 }
 0x28f   : > { %713 = vst.msk [vmem:[#allocation7] sm:$0x3] %vm712_vm5, %v1006_v17 }
 0x290 PF: > { %p1348_p9 = scmp.eq.s32.totalorder %s787_s18, 3  ;;  %s1123_s26 = smov [#allocation7]  }
 0x291   : > { %s723_s15 = sshll.u32 %s1123_s26, 4  ;;  %s724_s15 = int_to_ptr.vmem [resolvable:$true] %s723_s15 }
 0x292   : > { %s1035_s22 = scalar_lea.vmem %s724_s15, 32  ;;  %p1042_p13 = scmp.lt.s32.totalorder %s724_s15, %s724_s15 }
 0x293   : > { %p1036_p10 = scmp.ne.s32.totalorder %s724_s15, %s1035_s22  ;;  %p1043_p0 = scmp.lt.s32.totalorder %s1035_s22, %s1035_s22 }
 0x295   : > { %p1037_p11 = pnand %p1036_p10, %p1348_p9  ;;  %p1044_p1 = por %p1043_p0, %p1042_p13 }
 0x297   : > { %p1038_p12 = pneg %p1037_p11 }
 0x299   : > { %p1045_p2 = pnand %p1044_p1, %p1038_p12 }
 0x29b   : > { %1048 = shalt.err (!%p1045_p2)
}
 0x29c   : > { %937 = dma.vmem_to_hbm [thread:$0]  (%p1348_p9), %s724_s15, 32, %s1384_s3, [#allocation6]  }
 0x29d   : > { %1088 = dma.done.wait (%p1348_p9), [#allocation6], 32  }
 0x29e   : > { %1090 = vsyncadd (%p1348_p9), [#allocation6], 4294967264 }
 0x29f PF: > { %s17_s17 = sadd.s32 1, %s1113_s17   ;;  %s1388_s12 = smov %s1097_s13 }
 0x2a0   : > { %p14_p3 = scmp.ge.s32.totalorder %s17_s17, 6   ;;  %s1389_s13 = smov %s1101_s14 }
 0x2a1   : > { %s1390_s14 = smov %s1191_s23  ;;  %s1391_s15 = smov %s1109_s16 }
 0x2a2   : > { %s1392_s16 = smov %s1394_s19  ;;  %16 = sbr.rel (!%p14_p3) target bundleno = 5 (0x5), region = 78 }
 0x2a7   :  { %736 = vsyncpa [#allocation5], 1 }
 0x2a8   :  { %738 = vsyncpa [#allocation5 + $0x1], 1 }
 0x2a9   :  { %739 = vsyncpa [#allocation6], 1 }
 0x2aa   :  { %741 = vsyncpa [#allocation6 + $0x1], 1 }

</bundles_post_ra>
